<compile_context>
chip_gen: v6e
topology: v6e:2x2x1
jax: 0.10.0
libtpu: 0.0.40
codegen_flags: <defaults>
</compile_context>

<pallas_src>
import functools

import jax
import jax.numpy as jnp
from jax.experimental import pallas as pl
from jax.experimental.pallas import tpu as pltpu


def _round_up(x, m):
    return ((x + m - 1) // m) * m


def _apply_activation(y, act, mlp_type, n_real):
    """Per-layer activation in f32 (matches the PyTorch forward)."""
    if act == 'relu':
        return jnp.maximum(y, 0.0)
    if act == 'sigmoid':
        return jax.nn.sigmoid(y)
    if act == 'relu6':
        return jnp.clip(y, 0.0, 6.0)
    if act == 'output':
        if mlp_type == 'Classifier':
            # Final layer is zero-padded to a lane-dense 128-wide slab: mask the
            # padded logit columns to -inf so they don't pollute the softmax.
            col = jax.lax.broadcasted_iota(jnp.int32, y.shape, 1)
            y = jnp.where(col < n_real, y, -jnp.inf)
            y = y - jnp.max(y, axis=-1, keepdims=True)
            e = jnp.exp(y)
            denom = jnp.sum(e, axis=-1, keepdims=True)
            inv = pl.reciprocal(denom, approx=True)      # EUP slot (free-ish)
            inv = inv * (2.0 - denom * inv)              # 1 Newton step -> ~f32 exact
            return e * inv
        if mlp_type == 'RegressorSigmoid':
            return jax.nn.sigmoid(y) * 10.0 - 2.0
        if mlp_type == 'RegressorRelu6':
            return jnp.clip(y, 0.0, 6.0)
        return y  # plain 'Regressor': identity on the output layer
    return y


def _fused_mlp_kernel(*refs, acts, mlp_type, n_real):
    """Whole MLP forward for one (TM, K) batch tile.

    refs = (x_ref, w0_ref, b0_ref, w1_ref, b1_ref, ..., o_ref).
    Intermediates live in vregs; weights/biases are VMEM-resident across grid
    steps (constant index_maps), so only x/out tiles move HBM<->VMEM.
    """
    x_ref, o_ref = refs[0], refs[-1]
    param_refs = refs[1:-1]

    h = x_ref[...]                          # f32 activations (no redundant cast)
    for i, act in enumerate(acts):          # unrolled at trace time (fixed layer count)
        w = param_refs[2 * i][...]          # bf16 weights
        b = param_refs[2 * i + 1][...]      # f32 (1, N) bias
        y = jnp.dot(h.astype(jnp.bfloat16), w,
                    preferred_element_type=jnp.float32) + b
        h = _apply_activation(y, act, mlp_type, n_real)
    o_ref[...] = h                          # lane-dense (TM, n_pad) f32 store


def mlp_forward(x, params_flat, *, acts, mlp_type, n_real, tm_max=512):
    """MLP forward as one batch-tiled pallas_call.

    x: (M, K0); params_flat = (w0, b0, ...) with wi:(Ki, Ki+1) bf16, bi:(1, Ki+1) f32.
    The last layer is padded to n_pad (multiple of 128) output columns.
    """
    x = x.astype(jnp.float32)
    M, K0 = x.shape
    n_pad = params_flat[-2].shape[1]

    # Batch tile: big enough to amortize per-grid-step overhead (~0.35us), small
    # enough that 2x double-buffered (TM,K0)+(TM,n_pad) f32 tiles + all params
    # fit with huge headroom in v7x's 64 MiB VMEM (<1 MiB at TM=512).
    TM = min(tm_max, _round_up(M, 8))
    M_pad = _round_up(M, TM)
    if M_pad != M:
        x = jnp.pad(x, ((0, M_pad - M), (0, 0)))
    grid = (M_pad // TM,)

    in_specs = [pl.BlockSpec((TM, K0), lambda i: (i, 0))]
    # Whole-array, constant-index blocks: weights/biases stay VMEM-resident.
    for p in params_flat:
        in_specs.append(pl.BlockSpec(p.shape, lambda i: (0, 0)))
    out_spec = pl.BlockSpec((TM, n_pad), lambda i: (i, 0))

    # Advisory cost estimate so XLA can overlap this custom call with neighbors.
    flops = 2 * M_pad * sum(
        params_flat[2 * i].shape[0] * params_flat[2 * i].shape[1]
        for i in range(len(acts)))
    transc = 0
    for i, act in enumerate(acts):
        n_out_i = params_flat[2 * i].shape[1]
        if act == 'sigmoid':
            transc += M_pad * n_out_i
        elif act == 'output' and mlp_type in ('Classifier', 'RegressorSigmoid'):
            transc += M_pad * n_out_i
    bytes_accessed = (M_pad * K0 * 4 + M_pad * n_pad * 4
                      + sum(int(p.size) * p.dtype.itemsize for p in params_flat))

    kernel = functools.partial(_fused_mlp_kernel, acts=acts,
                               mlp_type=mlp_type, n_real=n_real)
    out = pl.pallas_call(
        kernel,
        out_shape=jax.ShapeDtypeStruct((M_pad, n_pad), jnp.float32),
        grid=grid,
        in_specs=in_specs,
        out_specs=out_spec,
        compiler_params=pltpu.CompilerParams(
            dimension_semantics=("parallel",),        # 2-TC sharding on v7x
            vmem_limit_bytes=32 * 1024 * 1024),       # explicit, v7x-safe
        cost_estimate=pl.CostEstimate(
            flops=flops, transcendentals=transc, bytes_accessed=bytes_accessed),
    )(x, *params_flat)
    return out[:M, :n_real]


def mlp_reference(x, params_flat, acts, mlp_type, n_real):
    """Pure-JAX reference with identical numerics (bf16 dot inputs, f32 accum)."""
    h = x.astype(jnp.float32)
    for i, act in enumerate(acts):
        w, b = params_flat[2 * i], params_flat[2 * i + 1]
        h = jnp.dot(h.astype(w.dtype), w, preferred_element_type=jnp.float32) + b
        if act == 'relu':
            h = jnp.maximum(h, 0.0)
        elif act == 'sigmoid':
            h = jax.nn.sigmoid(h)
        elif act == 'relu6':
            h = jnp.clip(h, 0.0, 6.0)
        elif act == 'output':
            h = h[:, :n_real]                 # drop lane-padding columns
            if mlp_type == 'Classifier':
                h = jax.nn.softmax(h, axis=-1)
            elif mlp_type == 'RegressorSigmoid':
                h = jax.nn.sigmoid(h) * 10.0 - 2.0
            elif mlp_type == 'RegressorRelu6':
                h = jnp.clip(h, 0.0, 6.0)
    return h


class MLPPallas:
    """JAX/Pallas port of the PyTorch MLP module (forward only, fully fused)."""

    def __init__(self, num_features, layers, mlp_type, n_classes=5, key=None):
        self.type = mlp_type
        self.n_classes = n_classes
        self.n_input = [num_features] + [n for n, _ in layers]
        self.n_output = [n for n, _ in layers] + [
            1 if mlp_type.startswith('Regressor') else n_classes
        ]
        self.functions = tuple([f for _, f in layers] + ['output'])
        self.n_real = self.n_output[-1]
        self.n_pad = max(128, _round_up(self.n_real, 128))   # lane-dense head

        if key is None:
            key = jax.random.PRNGKey(0)
        params = []
        n_layers = len(self.n_input)
        for li, (n_in, n_out) in enumerate(zip(self.n_input, self.n_output)):
            key, kw, kb = jax.random.split(key, 3)
            bound = 1.0 / (n_in ** 0.5)  # matches torch.nn.Linear default init
            w = jax.random.uniform(kw, (n_in, n_out), jnp.float32, -bound, bound)
            b = jax.random.uniform(kb, (1, n_out), jnp.float32, -bound, bound)
            if li == n_layers - 1 and n_out < self.n_pad:
                # Zero-pad the head to 128 output columns (lane-dense store).
                w = jnp.pad(w, ((0, 0), (0, self.n_pad - n_out)))
                b = jnp.pad(b, ((0, 0), (0, self.n_pad - n_out)))
            # bf16 weights (native MXU input dtype); biases stay f32.
            # TODO(synk): optional fp8 weight path for v7x's fp8 MXU; kept bf16
            #             for portability across v5e/v6e/v7x.
            params.extend([w.astype(jnp.bfloat16), b])
        self.params_flat = tuple(params)

        # jit the whole forward: one compiled custom call, no per-layer dispatch.
        self._forward = jax.jit(functools.partial(
            mlp_forward, acts=self.functions, mlp_type=self.type,
            n_real=self.n_real))

    def __call__(self, x):
        return self._forward(x, self.params_flat)


if __name__ == "__main__":
    key = jax.random.PRNGKey(0)
    k_in, k_cls, k_reg = jax.random.split(key, 3)

    batch = 8
    num_features = 16
    hidden_layers = [(32, 'relu'), (32, 'sigmoid')]

    x = jax.random.normal(k_in, (batch, num_features), jnp.float32)

    # --- Classifier head: softmax over 5 classes ---
    clf = MLPPallas(num_features, hidden_layers, 'Classifier', n_classes=5, key=k_cls)
    out_c = jax.block_until_ready(clf(x))
    ref_c = mlp_reference(x, clf.params_flat, clf.functions, clf.type, clf.n_real)
    assert out_c.shape == (batch, 5), out_c.shape
    assert out_c.dtype == jnp.float32
    assert jnp.allclose(jnp.sum(out_c, axis=-1), 1.0, atol=1e-5)
    assert jnp.allclose(out_c, ref_c, atol=2e-5, rtol=2e-5), \
        float(jnp.max(jnp.abs(out_c - ref_c)))

    # --- RegressorSigmoid head: scalar output in [-2, 8] ---
    reg = MLPPallas(num_features, [(32, 'relu'), (16, 'relu6')],
                    'RegressorSigmoid', key=k_reg)
    out_r = jax.block_until_ready(reg(x))
    ref_r = mlp_reference(x, reg.params_flat, reg.functions, reg.type, reg.n_real)
    assert out_r.shape == (batch, 1), out_r.shape
    assert jnp.allclose(out_r, ref_r, atol=2e-5, rtol=2e-5), \
        float(jnp.max(jnp.abs(out_r - ref_r)))

    print("KERNEL_OK")
</pallas_src>

<mosaic_0001>
module attributes {stable_mosaic.version = 11 : i64} {
  func.func @_fused_mlp_kernel(%arg0: i32, %arg1: memref<8x16xf32, #tpu.memory_space<vmem>>, %arg2: memref<16x32xbf16, #tpu.memory_space<vmem>>, %arg3: memref<1x32xf32, #tpu.memory_space<vmem>>, %arg4: memref<32x32xbf16, #tpu.memory_space<vmem>>, %arg5: memref<1x32xf32, #tpu.memory_space<vmem>>, %arg6: memref<32x128xbf16, #tpu.memory_space<vmem>>, %arg7: memref<1x128xf32, #tpu.memory_space<vmem>>, %arg8: memref<8x128xf32, #tpu.memory_space<vmem>>) attributes {dimension_semantics = [#tpu.dimension_semantics<parallel>], iteration_bounds = array<i64: 1>, scalar_prefetch = 0 : i64, scratch_operands = 0 : i64, tpu.core_type = #tpu.core_type<tc>, window_params = [{transform_indices = @transform_0, window_bounds = array<i64: 8, 16>}, {pipeline_mode = #tpu.pipeline_mode<synchronous>, transform_indices = @transform_1, window_bounds = array<i64: 16, 32>}, {pipeline_mode = #tpu.pipeline_mode<synchronous>, transform_indices = @transform_2, window_bounds = array<i64: 1, 32>}, {pipeline_mode = #tpu.pipeline_mode<synchronous>, transform_indices = @transform_3, window_bounds = array<i64: 32, 32>}, {pipeline_mode = #tpu.pipeline_mode<synchronous>, transform_indices = @transform_4, window_bounds = array<i64: 1, 32>}, {pipeline_mode = #tpu.pipeline_mode<synchronous>, transform_indices = @transform_5, window_bounds = array<i64: 32, 128>}, {pipeline_mode = #tpu.pipeline_mode<synchronous>, transform_indices = @transform_6, window_bounds = array<i64: 1, 128>}, {transform_indices = @transform_7, window_bounds = array<i64: 8, 128>}]} {
    %c0 = arith.constant 0 : index
    %c0_0 = arith.constant 0 : index
    %0 = vector.load %arg1[%c0, %c0_0] : memref<8x16xf32, #tpu.memory_space<vmem>>, vector<8x16xf32>
    %c0_1 = arith.constant 0 : index
    %c0_2 = arith.constant 0 : index
    %1 = vector.load %arg2[%c0_1, %c0_2] : memref<16x32xbf16, #tpu.memory_space<vmem>>, vector<16x32xbf16>
    %c0_3 = arith.constant 0 : index
    %c0_4 = arith.constant 0 : index
    %2 = vector.load %arg3[%c0_3, %c0_4] : memref<1x32xf32, #tpu.memory_space<vmem>>, vector<1x32xf32>
    %3 = arith.truncf %0 : vector<8x16xf32> to vector<8x16xbf16>
    %cst = arith.constant dense<0.000000e+00> : vector<8x32xf32>
    %4 = tpu.matmul %3, %1, %cst {dimension_numbers = #tpu.dot_dimension_numbers<[1], [0], [0], [1], [0, 0, 1, 1], [], []>} : vector<8x16xbf16>, vector<16x32xbf16>, vector<8x32xf32> -> vector<8x32xf32>
    %5 = vector.broadcast %2 : vector<1x32xf32> to vector<8x32xf32>
    %6 = arith.addf %4, %5 : vector<8x32xf32>
    %cst_5 = arith.constant 0.000000e+00 : f32
    %7 = vector.broadcast %cst_5 : f32 to vector<8x32xf32>
    %8 = arith.maximumf %6, %7 : vector<8x32xf32>
    %c0_6 = arith.constant 0 : index
    %c0_7 = arith.constant 0 : index
    %9 = vector.load %arg4[%c0_6, %c0_7] : memref<32x32xbf16, #tpu.memory_space<vmem>>, vector<32x32xbf16>
    %c0_8 = arith.constant 0 : index
    %c0_9 = arith.constant 0 : index
    %10 = vector.load %arg5[%c0_8, %c0_9] : memref<1x32xf32, #tpu.memory_space<vmem>>, vector<1x32xf32>
    %11 = arith.truncf %8 : vector<8x32xf32> to vector<8x32xbf16>
    %cst_10 = arith.constant dense<0.000000e+00> : vector<8x32xf32>
    %12 = tpu.matmul %11, %9, %cst_10 {dimension_numbers = #tpu.dot_dimension_numbers<[1], [0], [0], [1], [0, 0, 1, 1], [], []>} : vector<8x32xbf16>, vector<32x32xbf16>, vector<8x32xf32> -> vector<8x32xf32>
    %13 = vector.broadcast %10 : vector<1x32xf32> to vector<8x32xf32>
    %14 = arith.addf %12, %13 : vector<8x32xf32>
    %15 = arith.negf %14 : vector<8x32xf32>
    %16 = math.exp %15 : vector<8x32xf32>
    %cst_11 = arith.constant 1.000000e+00 : f32
    %17 = vector.broadcast %cst_11 : f32 to vector<8x32xf32>
    %18 = arith.addf %17, %16 : vector<8x32xf32>
    %19 = arith.divf %17, %18 : vector<8x32xf32>
    %c0_12 = arith.constant 0 : index
    %c0_13 = arith.constant 0 : index
    %20 = vector.load %arg6[%c0_12, %c0_13] : memref<32x128xbf16, #tpu.memory_space<vmem>>, vector<32x128xbf16>
    %c0_14 = arith.constant 0 : index
    %c0_15 = arith.constant 0 : index
    %21 = vector.load %arg7[%c0_14, %c0_15] : memref<1x128xf32, #tpu.memory_space<vmem>>, vector<1x128xf32>
    %22 = arith.truncf %19 : vector<8x32xf32> to vector<8x32xbf16>
    %cst_16 = arith.constant dense<0.000000e+00> : vector<8x128xf32>
    %23 = tpu.matmul %22, %20, %cst_16 {dimension_numbers = #tpu.dot_dimension_numbers<[1], [0], [0], [1], [0, 0, 1, 1], [], []>} : vector<8x32xbf16>, vector<32x128xbf16>, vector<8x128xf32> -> vector<8x128xf32>
    %24 = vector.broadcast %21 : vector<1x128xf32> to vector<8x128xf32>
    %25 = arith.addf %23, %24 : vector<8x128xf32>
    %26 = tpu.iota {dimensions = array<i32: 1>} : vector<8x128xi32>
    %c5_i32 = arith.constant 5 : i32
    %27 = vector.broadcast %c5_i32 : i32 to vector<8x128xi32>
    %28 = arith.cmpi slt, %26, %27 : vector<8x128xi32>
    %cst_17 = arith.constant 0xFF800000 : f32
    %29 = vector.broadcast %cst_17 : f32 to vector<8x128xf32>
    %30 = arith.select %28, %25, %29 : vector<8x128xi1>, vector<8x128xf32>
    %cst_18 = arith.constant dense<0xFF800000> : vector<8xf32>
    %31 = vector.multi_reduction <maximumf>, %30, %cst_18 [1] : vector<8x128xf32> to vector<8xf32>
    %32 = vector.shape_cast %31 : vector<8xf32> to vector<8x1xf32>
    %33 = vector.broadcast %32 : vector<8x1xf32> to vector<8x128xf32>
    %34 = arith.subf %30, %33 : vector<8x128xf32>
    %35 = math.exp %34 : vector<8x128xf32>
    %cst_19 = arith.constant dense<0.000000e+00> : vector<8xf32>
    %36 = vector.multi_reduction <add>, %35, %cst_19 [1] : vector<8x128xf32> to vector<8xf32>
    %37 = vector.shape_cast %36 : vector<8xf32> to vector<8x1xf32>
    %38 = tpu.reciprocal %37 {approx = true} : vector<8x1xf32> -> vector<8x1xf32>
    %39 = arith.mulf %37, %38 : vector<8x1xf32>
    %cst_20 = arith.constant 2.000000e+00 : f32
    %40 = vector.broadcast %cst_20 : f32 to vector<8x1xf32>
    %41 = arith.subf %40, %39 : vector<8x1xf32>
    %42 = arith.mulf %38, %41 : vector<8x1xf32>
    %43 = vector.broadcast %42 : vector<8x1xf32> to vector<8x128xf32>
    %44 = arith.mulf %35, %43 : vector<8x128xf32>
    %c0_21 = arith.constant 0 : index
    %c0_22 = arith.constant 0 : index
    %45 = vector.load %arg8[%c0_21, %c0_22] : memref<8x128xf32, #tpu.memory_space<vmem>>, vector<8x128xf32>
    tpu.vector_store %arg8[%c0_21, %c0_22], %44 {strides = array<i32>} : memref<8x128xf32, #tpu.memory_space<vmem>>, vector<8x128xf32>,
    return
  }
  func.func @transform_0(%arg0: i32) -> (i32, i32) {
    %c0_i32 = arith.constant 0 : i32
    %c0_i32_0 = arith.constant 0 : i32
    return %arg0, %c0_i32 : i32, i32
  }
  func.func @transform_1(%arg0: i32) -> (i32, i32) {
    %c0_i32 = arith.constant 0 : i32
    %c0_i32_0 = arith.constant 0 : i32
    %c0_i32_1 = arith.constant 0 : i32
    return %c0_i32, %c0_i32_0 : i32, i32
  }
  func.func @transform_2(%arg0: i32) -> (i32, i32) {
    %c0_i32 = arith.constant 0 : i32
    %c0_i32_0 = arith.constant 0 : i32
    %c0_i32_1 = arith.constant 0 : i32
    return %c0_i32, %c0_i32_0 : i32, i32
  }
  func.func @transform_3(%arg0: i32) -> (i32, i32) {
    %c0_i32 = arith.constant 0 : i32
    %c0_i32_0 = arith.constant 0 : i32
    %c0_i32_1 = arith.constant 0 : i32
    return %c0_i32, %c0_i32_0 : i32, i32
  }
  func.func @transform_4(%arg0: i32) -> (i32, i32) {
    %c0_i32 = arith.constant 0 : i32
    %c0_i32_0 = arith.constant 0 : i32
    %c0_i32_1 = arith.constant 0 : i32
    return %c0_i32, %c0_i32_0 : i32, i32
  }
  func.func @transform_5(%arg0: i32) -> (i32, i32) {
    %c0_i32 = arith.constant 0 : i32
    %c0_i32_0 = arith.constant 0 : i32
    %c0_i32_1 = arith.constant 0 : i32
    return %c0_i32, %c0_i32_0 : i32, i32
  }
  func.func @transform_6(%arg0: i32) -> (i32, i32) {
    %c0_i32 = arith.constant 0 : i32
    %c0_i32_0 = arith.constant 0 : i32
    %c0_i32_1 = arith.constant 0 : i32
    return %c0_i32, %c0_i32_0 : i32, i32
  }
  func.func @transform_7(%arg0: i32) -> (i32, i32) {
    %c0_i32 = arith.constant 0 : i32
    %c0_i32_0 = arith.constant 0 : i32
    return %arg0, %c0_i32 : i32, i32
  }
}

</mosaic_0001>

<bundles_post_ra>
// kernel: mlp_forward.1
= control target key start
LH: loop header
LB: loop body
LE: loop exit
PB: predicated region body
PF: predicated region fallthrough
CT: control target
= control target key end

     0   :  { %12 = vsyncpa [#allocation3], 0  ;;  %s574_s0 = inlined_call_operand.hbm [shape: f32[8,16], index: 0, kind: input, shape index: {}]   ;;  %s575_s1 = inlined_call_operand.hbm [shape: bf16[16,32], index: 1, kind: input, shape index: {}]   ;;  %s576_s2 = inlined_call_operand.vmem [shape: f32[1,32], index: 2, kind: input, shape index: {}]   ;;  %s577_s3 = inlined_call_operand.hbm [shape: bf16[32,32], index: 3, kind: input, shape index: {}]   ;;  %s578_s4 = inlined_call_operand.vmem [shape: f32[1,32], index: 4, kind: input, shape index: {}]   ;;  %s579_s5 = inlined_call_operand.hbm [shape: bf16[32,128], index: 5, kind: input, shape index: {}]   ;;  %s580_s6 = inlined_call_operand.vmem [shape: f32[1,128], index: 6, kind: input, shape index: {}]   ;;  %s581_s7 = inlined_call_operand.hbm [shape: f32[8,128], index: 7, kind: output, shape index: {}]  }
   0x1   :  { %13 = vsyncpa [#allocation6], 0 }
   0x2   :  { %14 = vsyncpa [#allocation9], 0 }
   0x3   :  { %15 = vsyncpa [#allocation4], 0  ;;  %s490_s24 = smov [#allocation5]  }
   0x4   :  { %s31_s25 = sshll.u32 %s490_s24, 4  ;;  %s32_s25 = int_to_ptr.vmem [resolvable:$true] %s31_s25 }
   0x5   :  { %s390_s26 = scalar_lea.vmem %s32_s25, 128  ;;  %p395_p1 = scmp.lt.s32.totalorder %s32_s25, %s32_s25 }
   0x6   :  { %p391_p0 = scmp.ne.s32.totalorder %s32_s25, %s390_s26  ;;  %p396_p2 = scmp.lt.s32.totalorder %s390_s26, %s390_s26 }
   0x8   :  { %p397_p3 = por %p396_p2, %p395_p1 }
   0xa   :  { %p398_p4 = pnand %p397_p3, %p391_p0 }
   0xc   :  { %401 = shalt.err (!%p398_p4)
}
   0xd   :  { %s491_s27 = smov 64   ;;  %s492_s28 = smov 4  }
   0xe   :  { %37 = dma.hbm_to_vmem [thread:$0]  %s575_s1, 128, %s32_s25, [#allocation6], %s491_s27, %s491_s27, %s492_s28  }
   0xf   :  { %s493_s8 = smov [#allocation2]   ;;  %s494_s10 = smov [#allocation7]  }
  0x10   :  { %s22_s9 = sshll.u32 %s493_s8, 4  ;;  %s45_s11 = sshll.u32 %s494_s10, 4  ;;  %s23_s9 = int_to_ptr.vmem [resolvable:$true] %s22_s9  ;;  %s46_s11 = int_to_ptr.vmem [resolvable:$true] %s45_s11 }
  0x11   :  { %s410_s12 = scalar_lea.vmem %s23_s9, 128  ;;  %p415_p6 = scmp.lt.s32.totalorder %s23_s9, %s23_s9 }
  0x12   :  { %p411_p5 = scmp.ne.s32.totalorder %s23_s9, %s410_s12  ;;  %p416_p7 = scmp.lt.s32.totalorder %s410_s12, %s410_s12 }
  0x14   :  { %p417_p8 = por %p416_p7, %p415_p6 }
  0x16   :  { %p418_p9 = pnand %p417_p8, %p411_p5 }
  0x18   :  { %421 = shalt.err (!%p418_p9)
}
  0x19   :  { %25 = dma.hbm_to_vmem [thread:$0]  %s574_s0, 128, %s23_s9, [#allocation3]  }
  0x1a   :  { %s430_s15 = scalar_lea.vmem %s46_s11, 256  ;;  %p435_p11 = scmp.lt.s32.totalorder %s46_s11, %s46_s11 }
  0x1b   :  { %p431_p10 = scmp.ne.s32.totalorder %s46_s11, %s430_s15  ;;  %p436_p12 = scmp.lt.s32.totalorder %s430_s15, %s430_s15 }
  0x1d   :  { %p437_p13 = por %p436_p12, %p435_p11 }
  0x1f   :  { %p438_p0 = pnand %p437_p13, %p431_p10 }
  0x21   :  { %441 = shalt.err (!%p438_p0)
}
  0x22   :  { %51 = dma.hbm_to_vmem [thread:$0]  %s577_s3, 256, %s46_s11, [#allocation6], %s491_s27, %s491_s27, %s492_s28  }
  0x23   :  { %s495_s17 = smov [#allocation8]  }
  0x24   :  { %s59_s18 = sshll.u32 %s495_s17, 4  ;;  %s60_s18 = int_to_ptr.vmem [resolvable:$true] %s59_s18 }
  0x25   :  { %s450_s19 = scalar_lea.vmem %s60_s18, 256  ;;  %p455_p2 = scmp.lt.s32.totalorder %s60_s18, %s60_s18 }
  0x26   :  { %p451_p1 = scmp.ne.s32.totalorder %s60_s18, %s450_s19  ;;  %p456_p3 = scmp.lt.s32.totalorder %s450_s19, %s450_s19 }
  0x28   :  { %p457_p4 = por %p456_p3, %p455_p2 }
  0x2a   :  { %p458_p5 = pnand %p457_p4, %p451_p1 }
  0x2c   :  { %461 = shalt.err (!%p458_p5)
}
  0x2d   :  { %65 = dma.hbm_to_vmem [thread:$0]  %s579_s5, 256, %s60_s18, [#allocation9], %s491_s27, %s491_s27, %s492_s28  }
  0x2e   :  { %482 = dma.done.wait [#allocation3], 128  }
  0x2f   :  { %483 = vsyncadd [#allocation3], 4294967168 }
  0x30   :  { %484 = dma.done.wait [#allocation6], 384  }
  0x31   :  { %485 = vsyncadd [#allocation6], 4294966912 }
  0x32   :  { %486 = dma.done.wait [#allocation9], 256  }
  0x33   :  { %487 = vsyncadd [#allocation9], 4294967040  ;;  %v496_v0 = vmov 0.0   ;;  %vm497_vm0 = vmmov 0   ;;  %v369_v1 = vld [vmem:[#allocation5] sm:$0xff]   ;;  %v81_v2 = vld [vmem:[#allocation2] sm:$0xff]  ;;  %v284_v27 = vlaneseq }
  0x34   :  { %338 = vmatprep.subr.bf16.mxu0 %v496_v0  ;;  %340 = vmatprep.mubr.msk.bf16.mxu0 %vm497_vm0, %v496_v0  ;;  %vm98_vm1 = vcmask 130048   ;;  %v85_v3 = vpack.c.bf16 %v81_v2, %v81_v2  ;;  %v370_v4 = vld [vmem:[#allocation7 + $0x8] sm:$0xff]   ;;  %v371_v5 = vld [vmem:[#allocation7] sm:$0xff]   ;;  %v318_v6 = vld [vmem:[%s576_s2] ss:$0 sm:$0xff]  ;;  %vm167_vm2 = vcmask 261120  }
  0x35   :  { %344 = vmatprep.subr.bf16.mxu1 %v496_v0  ;;  %348 = vmatprep.mubr.msk.bf16.mxu1 %vm497_vm0, %v496_v0  ;;  %v372_v14 = vld [vmem:[#allocation8 + $0x8] sm:$0xff]   ;;  %v373_v15 = vld [vmem:[#allocation8] sm:$0xff]   ;;  %v285_v28 = vand.u32 127, %v284_v27 }
  0x36   :  { %339 = vmatpush3.bf16.msra.mxu0 %v369_v1  ;;  %345 = vmatpush3.bf16.msra.mxu1 %v370_v4  ;;  %v321_v16 = vld [vmem:[%s578_s4] ss:$0 sm:$0xff]  ;;  %s498_s4 = smov [#allocation10]  }
  0x37   :  { %352 = vmatprep.subr.bf16.mxu0 %v496_v0  ;;  %346 = vmatprep.subr.bf16.mxu1 %v496_v0  ;;  %v326_v29 = vld [vmem:[%s580_s6] ss:$0 sm:$0xff]  ;;  %vm286_vm3 = vcmp.lt.s32.totalorder %v285_v28, 5  ;;  %s307_s6 = sshll.u32 %s498_s4, 4  ;;  %s308_s6 = int_to_ptr.vmem [resolvable:$true] %s307_s6 }
  0x38   :  { %s462_s24 = scalar_lea.vmem %s308_s6, 128  ;;  %p467_p7 = scmp.lt.s32.totalorder %s308_s6, %s308_s6 }
  0x39   :  { %341 = vmatmul.mubr.msk.bf16.vlgmr.msra.gmra.mxu0 %vm98_vm1, %v85_v3  ;;  %p463_p6 = scmp.ne.s32.totalorder %s308_s6, %s462_s24  ;;  %p468_p8 = scmp.lt.s32.totalorder %s462_s24, %s462_s24 }
  0x3a   :  { %356 = vmatprep.mubr.msk.bf16.mxu0 %vm497_vm0, %v496_v0  ;;  %347 = vmatpush3.bf16.msra.mxu1 %v371_v5 }
  0x3b   :  { %353 = vmatpush3.bf16.msra.mxu0 %v372_v14  ;;  %p469_p9 = por %p468_p8, %p467_p7 }
  0x3c   :  { %354 = vmatprep.subr.bf16.mxu0 %v496_v0 }
  0x3d   :  { %p470_p10 = pnand %p469_p9, %p463_p6 }
  0x3f   :  { %355 = vmatpush3.bf16.msra.mxu0 %v373_v15 }
  0xf9   :  { %v136_v7 = vpop.f32.mrf.mxu0 }
  0xfa   :  { %v137_v8 = vadd.f32 %v318_v6, %v136_v7 }
  0xfb   :  { %v342_v9 = vpop.f32.mrf.mxu0 }
  0xfc   :  { %v142_v10 = vmax.f32 %v137_v8, 0.0 }
  0xfd   :  { %v139_v11 = vpop.f32.mrf.mxu0 }
  0xfe   :  { %v148_v12 = vpack.c.bf16 %v142_v10, %v142_v10 }
  0xff   :  { %v343_v13 = vpop.f32.mrf.mxu0 }
 0x100   :  { %349 = vmatmul.mubr.msk.bf16.vlgmr.msra.gmra.mxu1 %vm167_vm2, %v148_v12 }
 0x1c0   :  { %v205_v17 = vpop.f32.mrf.mxu1 }
 0x1c1   :  { %v206_v18 = vadd.f32 %v321_v16, %v205_v17 }
 0x1c2   :  { %v350_v19 = vpop.f32.mrf.mxu1 }
 0x1c3   :  { %v325_v20 = vmul.f32 -1.442695, %v206_v18 }
 0x1c4   :  { %v208_v21 = vpop.f32.mrf.mxu1 }
 0x1c5   :  { %374 = vpow2.f32 %v325_v20 }
 0x1c6   :  { %v351_v22 = vpop.f32.mrf.mxu1 }
 0x1d2   :  { %v375_v23 = vpop.eup %374 }
 0x1d3   :  { %v214_v24 = vadd.f32 1.0, %v375_v23 }
 0x1d5   :  { %376 = vrcp.f32 %v214_v24 }
 0x1e2   :  { %v377_v25 = vpop.eup %376 }
 0x1e3   :  { %v222_v26 = vpack.c.bf16 %v377_v25, %v377_v25 }
 0x1e5   :  { %357 = vmatmul.mubr.msk.bf16.vlgmr.msra.gmra.mxu0 %vm167_vm2, %v222_v26 }
 0x2a5   :  { %v278_v30 = vpop.f32.mrf.mxu0 }
 0x2a6   :  { %v279_v31 = vadd.f32 %v326_v29, %v278_v30 }
 0x2a7   :  { %v358_v32 = vpop.f32.mrf.mxu0 }
 0x2a8   :  { %v287_v33 = vsel %vm286_vm3, %v279_v31, -inf }
 0x2a9   :  { %288 = vmax.xlane.f32.xlu0 %v287_v33  ;;  %v281_v34 = vpop.f32.mrf.mxu0 }
 0x2ab   :  { %v359_v35 = vpop.f32.mrf.mxu0 }
 0x332   :  { %v289_v36 = vpop.xlane.xlu0 %288 }
 0x333   :  { %v290_v37 = vsub.f32 %v287_v33, %v289_v36 }
 0x335   :  { %v291_v38 = vmul.f32 1.442695, %v290_v37 }
 0x337   :  { %378 = vpow2.f32 %v291_v38 }
 0x344   :  { %v379_v39 = vpop.eup %378 }
 0x345   :  { %293 = vadd.xlane.f32.xlu0 %v379_v39 }
 0x3ce   :  { %v294_v40 = vpop.xlane.xlu0 %293 }
 0x3cf   :  { %380 = vrcp.f32 %v294_v40 }
 0x3dc   :  { %v381_v41 = vpop.eup %380 }
 0x3dd   :  { %v296_v42 = vmul.f32 %v381_v41, %v294_v40 }
 0x3df   :  { %v297_v43 = vsub.f32 2.0, %v296_v42 }
 0x3e1   :  { %v298_v44 = vmul.f32 %v381_v41, %v297_v43 }
 0x3e3   :  { %v299_v45 = vmul.f32 %v379_v39, %v298_v44 }
 0x3e5   :  { %300 = vst [vmem:[#allocation10] sm:$0xff] %v299_v45 }
 0x3e6   :  { %473 = shalt.err (!%p470_p10)
}
 0x3e7   :  { %310 = dma.vmem_to_hbm [thread:$0]  %s308_s6, 128, %s581_s7, [#allocation4]  }
 0x3e8   :  { %488 = dma.done.wait [#allocation4], 128  }
 0x3e9   :  { %489 = vsyncadd [#allocation4], 4294967168 }
 0x3ea   :  { %314 = vsyncpa [#allocation3], 1 }
 0x3eb   :  { %315 = vsyncpa [#allocation6], 1 }
 0x3ec   :  { %316 = vsyncpa [#allocation9], 1 }
 0x3ed   :  { %317 = vsyncpa [#allocation4], 1 }

</bundles_post_ra>
